<compile_context>
chip_gen: v5e
topology: v5e:2x2
jax: 0.10.0
libtpu: 0.0.40
codegen_flags: <defaults>
</compile_context>

<pallas_src>
import functools

import jax
import jax.numpy as jnp
from jax.experimental import pallas as pl
from jax.experimental.pallas import tpu as pltpu


def projection_head_kernel(x_ref, w1_ref, b1_ref, w2_ref, b2_ref,
                           gamma_ref, beta_ref, o_ref, *, approx_gelu):
    # projected = self.projection(x)   (MXU matmul in native dtype, f32 acc)
    projected = jnp.dot(x_ref[...], w1_ref[...],
                        preferred_element_type=jnp.float32)
    projected = projected + b1_ref[...].astype(jnp.float32)

    # x = self.gelu(projected)
    if approx_gelu:
        # tanh approximation: transcendental lands on the EUP slot and the
        # VALU polynomial of erf disappears (slight numeric drift vs PyTorch).
        c = jnp.float32(0.7978845608028654)  # sqrt(2/pi)
        p3 = projected * projected * projected
        h = 0.5 * projected * (1.0 + jnp.tanh(c * (projected + 0.044715 * p3)))
    else:
        # exact erf form -- matches PyTorch nn.GELU() default.
        inv_sqrt2 = jnp.float32(0.7071067811865476)
        h = 0.5 * projected * (1.0 + jax.lax.erf(projected * inv_sqrt2))

    # x = self.fc(x)   (cast activations back to the weight dtype for the MXU)
    y = jnp.dot(h.astype(w2_ref.dtype), w2_ref[...],
                preferred_element_type=jnp.float32)
    y = y + b2_ref[...].astype(jnp.float32)

    # x = self.dropout(x)  -> identity in eval mode
    # x = x + projected
    y = y + projected

    # x = self.layer_norm(x)   (eps=1e-5, affine, biased variance)
    # Fused single-pass statistics: E[y] and E[y^2] computed together.
    mean = jnp.mean(y, axis=-1, keepdims=True)
    mean_sq = jnp.mean(y * y, axis=-1, keepdims=True)
    var = jnp.maximum(mean_sq - mean * mean, 0.0)
    y_norm = (y - mean) * jax.lax.rsqrt(var + jnp.float32(1e-5))
    o_ref[...] = (y_norm * gamma_ref[...].astype(jnp.float32)
                  + beta_ref[...].astype(jnp.float32)).astype(o_ref.dtype)


def _round_up(n, m):
    return ((n + m - 1) // m) * m


def _vmem_bytes(tb, E, P, x_dtype, w_dtype, out_dtype):
    """Rough per-step working-set estimate (bytes)."""
    x_bytes = 2 * tb * E * jnp.dtype(x_dtype).itemsize      # double-buffered in
    out_bytes = 2 * tb * P * jnp.dtype(out_dtype).itemsize  # double-buffered out
    w_bytes = (E * P + P * P + 4 * P) * jnp.dtype(w_dtype).itemsize  # resident
    inter = 4 * tb * P * 4                                   # f32 intermediates
    return x_bytes + out_bytes + w_bytes + inter


def _default_block_b():
    # Generation-aware default batch tile: 1024 on 128 MiB-VMEM parts
    # (v5e / v6e), 512 on the 64 MiB part (v7x).
    try:
        vmem = pltpu.get_tpu_info().vmem_capacity_bytes
    except Exception:
        vmem = 64 << 20
    return 1024 if vmem >= (128 << 20) else 512


@functools.partial(jax.jit,
                   static_argnames=("block_b", "out_dtype", "approx_gelu"))
def projection_head(x, w1, b1, w2, b2, gamma, beta,
                    *, block_b=None, out_dtype=None, approx_gelu=False):
    B, E = x.shape
    P = w1.shape[1]
    if out_dtype is None:
        out_dtype = x.dtype
    if block_b is None:
        block_b = _default_block_b()

    # Batch tile: multiple of 8 sublanes, no bigger than the (rounded) batch.
    tb = _round_up(min(block_b, _round_up(B, 8)), 8)

    # Shrink the tile if the working set would exceed a budget that is safe on
    # every generation (v7x: 64 MiB physical VMEM; the limit below adds 50%).
    budget = 28 << 20
    while tb > 64 and _vmem_bytes(tb, E, P, x.dtype, w1.dtype, out_dtype) > budget:
        tb = _round_up(max(tb // 2, 64), 8)

    grid_b = pl.cdiv(B, tb)
    # Keep >= 2 grid steps when there is enough work so the 'parallel' batch
    # axis can be split across both v7x TensorCores (no-op on v5e/v6e).
    if grid_b == 1 and B >= 16:
        tb = _round_up(pl.cdiv(B, 2), 8)
        grid_b = pl.cdiv(B, tb)

    # Biases / LN affine kept 2D (1, P) so they sit cleanly on lanes.
    b1_2d = b1.reshape(1, P)
    b2_2d = b2.reshape(1, P)
    gamma_2d = gamma.reshape(1, P)
    beta_2d = beta.reshape(1, P)

    tiled = lambda shape: pl.BlockSpec(shape, lambda i: (i, 0))
    # Constant-index blocks stay resident in VMEM (Pallas skips the re-fetch
    # when the block index does not change between steps).
    resident = lambda shape: pl.BlockSpec(shape, lambda i: (0, 0))

    est = _vmem_bytes(tb, E, P, x.dtype, w1.dtype, out_dtype)
    vmem_limit = int(min(max(est * 3 // 2, 32 << 20), 48 << 20))

    w_itemsize = jnp.dtype(w1.dtype).itemsize
    cost = pl.CostEstimate(
        flops=2 * B * P * (E + P),
        transcendentals=2 * B * P,  # GELU erf/tanh per element + LN rsqrt
        bytes_accessed=(B * E * jnp.dtype(x.dtype).itemsize
                        + B * P * jnp.dtype(out_dtype).itemsize
                        + (E * P + P * P) * w_itemsize
                        + 4 * P * jnp.dtype(b1.dtype).itemsize),
    )

    kernel = functools.partial(projection_head_kernel, approx_gelu=approx_gelu)

    return pl.pallas_call(
        kernel,
        out_shape=jax.ShapeDtypeStruct((B, P), out_dtype),
        grid=(grid_b,),
        in_specs=[
            tiled((tb, E)),       # x            (batch-tiled, double-buffered)
            resident((E, P)),     # projection.weight   (resident in VMEM)
            resident((1, P)),     # projection.bias
            resident((P, P)),     # fc.weight
            resident((1, P)),     # fc.bias
            resident((1, P)),     # layer_norm.weight
            resident((1, P)),     # layer_norm.bias
        ],
        out_specs=tiled((tb, P)),
        compiler_params=pltpu.CompilerParams(
            dimension_semantics=("parallel",),
            vmem_limit_bytes=vmem_limit),
        cost_estimate=cost,
    )(x, w1, b1_2d, w2, b2_2d, gamma_2d, beta_2d)


def reference(x, w1, b1, w2, b2, gamma, beta):
    projected = x @ w1 + b1
    h = jax.nn.gelu(projected, approximate=False)
    y = h @ w2 + b2
    y = y + projected
    mean = jnp.mean(y, axis=-1, keepdims=True)
    var = jnp.var(y, axis=-1, keepdims=True)
    return (y - mean) / jnp.sqrt(var + 1e-5) * gamma + beta


if __name__ == "__main__":
    # Small demo shapes; the real model uses E=768, P=512, large B.
    # B=72 deliberately not a multiple of the tile to exercise the
    # no-pad ragged-last-block path.
    B, E, P = 72, 64, 128

    key = jax.random.PRNGKey(0)
    kx, kw1, kb1, kw2, kb2 = jax.random.split(key, 5)

    x = jax.random.normal(kx, (B, E), dtype=jnp.float32)
    w1 = jax.random.normal(kw1, (E, P), dtype=jnp.float32) * (1.0 / jnp.sqrt(E))
    b1 = jax.random.normal(kb1, (P,), dtype=jnp.float32) * 0.01
    w2 = jax.random.normal(kw2, (P, P), dtype=jnp.float32) * (1.0 / jnp.sqrt(P))
    b2 = jax.random.normal(kb2, (P,), dtype=jnp.float32) * 0.01
    gamma = jnp.ones((P,), dtype=jnp.float32)
    beta = jnp.zeros((P,), dtype=jnp.float32)

    ref = reference(x, w1, b1, w2, b2, gamma, beta)

    # f32 path, explicit small tile -> multi-step grid with a ragged last block.
    out = projection_head(x, w1, b1, w2, b2, gamma, beta, block_b=32)
    out = jax.block_until_ready(out)
    assert out.shape == (B, P)
    err = float(jnp.max(jnp.abs(out - ref)))
    assert jnp.allclose(out, ref, atol=1e-4, rtol=1e-4), err

    # bf16 MXU-operand + bf16-output path (memory-bound-friendly), default tile.
    out_bf16 = projection_head(
        x.astype(jnp.bfloat16), w1.astype(jnp.bfloat16), b1,
        w2.astype(jnp.bfloat16), b2, gamma, beta,
        out_dtype=jnp.bfloat16)
    out_bf16 = jax.block_until_ready(out_bf16)
    err16 = float(jnp.max(jnp.abs(out_bf16.astype(jnp.float32) - ref)))
    assert jnp.allclose(out_bf16.astype(jnp.float32), ref,
                        atol=2e-1, rtol=2e-1), err16

    # TODO(synk): training-mode dropout (random mask) is not implemented; the
    # kernel implements eval-mode (identity) dropout only.
    print("KERNEL_OK")
</pallas_src>

<mosaic_0001>
module attributes {stable_mosaic.version = 11 : i64} {
  func.func @projection_head_kernel(%arg0: i32, %arg1: memref<32x64xf32, #tpu.memory_space<vmem>>, %arg2: memref<64x128xf32, #tpu.memory_space<vmem>>, %arg3: memref<1x128xf32, #tpu.memory_space<vmem>>, %arg4: memref<128x128xf32, #tpu.memory_space<vmem>>, %arg5: memref<1x128xf32, #tpu.memory_space<vmem>>, %arg6: memref<1x128xf32, #tpu.memory_space<vmem>>, %arg7: memref<1x128xf32, #tpu.memory_space<vmem>>, %arg8: memref<32x128xf32, #tpu.memory_space<vmem>>) attributes {dimension_semantics = [#tpu.dimension_semantics<parallel>], iteration_bounds = array<i64: 3>, scalar_prefetch = 0 : i64, scratch_operands = 0 : i64, tpu.core_type = #tpu.core_type<tc>, window_params = [{transform_indices = @transform_0, window_bounds = array<i64: 32, 64>}, {pipeline_mode = #tpu.pipeline_mode<synchronous>, transform_indices = @transform_1, window_bounds = array<i64: 64, 128>}, {pipeline_mode = #tpu.pipeline_mode<synchronous>, transform_indices = @transform_2, window_bounds = array<i64: 1, 128>}, {pipeline_mode = #tpu.pipeline_mode<synchronous>, transform_indices = @transform_3, window_bounds = array<i64: 128, 128>}, {pipeline_mode = #tpu.pipeline_mode<synchronous>, transform_indices = @transform_4, window_bounds = array<i64: 1, 128>}, {pipeline_mode = #tpu.pipeline_mode<synchronous>, transform_indices = @transform_5, window_bounds = array<i64: 1, 128>}, {pipeline_mode = #tpu.pipeline_mode<synchronous>, transform_indices = @transform_6, window_bounds = array<i64: 1, 128>}, {transform_indices = @transform_7, window_bounds = array<i64: 32, 128>}]} {
    %c0 = arith.constant 0 : index
    %c0_0 = arith.constant 0 : index
    %0 = vector.load %arg1[%c0, %c0_0] : memref<32x64xf32, #tpu.memory_space<vmem>>, vector<32x64xf32>
    %c0_1 = arith.constant 0 : index
    %c0_2 = arith.constant 0 : index
    %1 = vector.load %arg2[%c0_1, %c0_2] : memref<64x128xf32, #tpu.memory_space<vmem>>, vector<64x128xf32>
    %cst = arith.constant dense<0.000000e+00> : vector<32x128xf32>
    %2 = tpu.matmul %0, %1, %cst {dimension_numbers = #tpu.dot_dimension_numbers<[1], [0], [0], [1], [0, 0, 1, 1], [], []>} : vector<32x64xf32>, vector<64x128xf32>, vector<32x128xf32> -> vector<32x128xf32>
    %c0_3 = arith.constant 0 : index
    %c0_4 = arith.constant 0 : index
    %3 = vector.load %arg3[%c0_3, %c0_4] : memref<1x128xf32, #tpu.memory_space<vmem>>, vector<1x128xf32>
    %4 = vector.broadcast %3 : vector<1x128xf32> to vector<32x128xf32>
    %5 = arith.addf %2, %4 : vector<32x128xf32>
    %cst_5 = arith.constant 5.000000e-01 : f32
    %6 = vector.broadcast %cst_5 : f32 to vector<32x128xf32>
    %7 = arith.mulf %6, %5 : vector<32x128xf32>
    %cst_6 = arith.constant 0.707106769 : f32
    %8 = vector.broadcast %cst_6 : f32 to vector<32x128xf32>
    %9 = arith.mulf %5, %8 : vector<32x128xf32>
    %10 = math.erf %9 : vector<32x128xf32>
    %cst_7 = arith.constant 1.000000e+00 : f32
    %11 = vector.broadcast %cst_7 : f32 to vector<32x128xf32>
    %12 = arith.addf %11, %10 : vector<32x128xf32>
    %13 = arith.mulf %7, %12 : vector<32x128xf32>
    %c0_8 = arith.constant 0 : index
    %c0_9 = arith.constant 0 : index
    %14 = vector.load %arg4[%c0_8, %c0_9] : memref<128x128xf32, #tpu.memory_space<vmem>>, vector<128x128xf32>
    %cst_10 = arith.constant dense<0.000000e+00> : vector<32x128xf32>
    %15 = tpu.matmul %13, %14, %cst_10 {dimension_numbers = #tpu.dot_dimension_numbers<[1], [0], [0], [1], [0, 0, 1, 1], [], []>} : vector<32x128xf32>, vector<128x128xf32>, vector<32x128xf32> -> vector<32x128xf32>
    %c0_11 = arith.constant 0 : index
    %c0_12 = arith.constant 0 : index
    %16 = vector.load %arg5[%c0_11, %c0_12] : memref<1x128xf32, #tpu.memory_space<vmem>>, vector<1x128xf32>
    %17 = vector.broadcast %16 : vector<1x128xf32> to vector<32x128xf32>
    %18 = arith.addf %15, %17 : vector<32x128xf32>
    %19 = arith.addf %18, %5 : vector<32x128xf32>
    %cst_13 = arith.constant dense<0.000000e+00> : vector<32xf32>
    %20 = vector.multi_reduction <add>, %19, %cst_13 [1] : vector<32x128xf32> to vector<32xf32>
    %21 = vector.shape_cast %20 : vector<32xf32> to vector<32x1xf32>
    %cst_14 = arith.constant 1.280000e+02 : f32
    %22 = vector.broadcast %cst_14 : f32 to vector<32x1xf32>
    %23 = arith.divf %21, %22 : vector<32x1xf32>
    %24 = arith.mulf %19, %19 : vector<32x128xf32>
    %cst_15 = arith.constant dense<0.000000e+00> : vector<32xf32>
    %25 = vector.multi_reduction <add>, %24, %cst_15 [1] : vector<32x128xf32> to vector<32xf32>
    %26 = vector.shape_cast %25 : vector<32xf32> to vector<32x1xf32>
    %cst_16 = arith.constant 1.280000e+02 : f32
    %27 = vector.broadcast %cst_16 : f32 to vector<32x1xf32>
    %28 = arith.divf %26, %27 : vector<32x1xf32>
    %29 = arith.mulf %23, %23 : vector<32x1xf32>
    %30 = arith.subf %28, %29 : vector<32x1xf32>
    %cst_17 = arith.constant 0.000000e+00 : f32
    %31 = vector.broadcast %cst_17 : f32 to vector<32x1xf32>
    %32 = arith.maximumf %30, %31 : vector<32x1xf32>
    %33 = vector.broadcast %23 : vector<32x1xf32> to vector<32x128xf32>
    %34 = arith.subf %19, %33 : vector<32x128xf32>
    %cst_18 = arith.constant 9.99999974E-6 : f32
    %35 = vector.broadcast %cst_18 : f32 to vector<32x1xf32>
    %36 = arith.addf %32, %35 : vector<32x1xf32>
    %37 = math.rsqrt %36 : vector<32x1xf32>
    %38 = vector.broadcast %37 : vector<32x1xf32> to vector<32x128xf32>
    %39 = arith.mulf %34, %38 : vector<32x128xf32>
    %c0_19 = arith.constant 0 : index
    %c0_20 = arith.constant 0 : index
    %40 = vector.load %arg6[%c0_19, %c0_20] : memref<1x128xf32, #tpu.memory_space<vmem>>, vector<1x128xf32>
    %41 = vector.broadcast %40 : vector<1x128xf32> to vector<32x128xf32>
    %42 = arith.mulf %39, %41 : vector<32x128xf32>
    %c0_21 = arith.constant 0 : index
    %c0_22 = arith.constant 0 : index
    %43 = vector.load %arg7[%c0_21, %c0_22] : memref<1x128xf32, #tpu.memory_space<vmem>>, vector<1x128xf32>
    %44 = vector.broadcast %43 : vector<1x128xf32> to vector<32x128xf32>
    %45 = arith.addf %42, %44 : vector<32x128xf32>
    %c0_23 = arith.constant 0 : index
    %c0_24 = arith.constant 0 : index
    %46 = vector.load %arg8[%c0_23, %c0_24] : memref<32x128xf32, #tpu.memory_space<vmem>>, vector<32x128xf32>
    tpu.vector_store %arg8[%c0_23, %c0_24], %45 {strides = array<i32>} : memref<32x128xf32, #tpu.memory_space<vmem>>, vector<32x128xf32>,
    return
  }
  func.func @transform_0(%arg0: i32) -> (i32, i32) {
    %c0_i32 = arith.constant 0 : i32
    %c0_i32_0 = arith.constant 0 : i32
    return %arg0, %c0_i32 : i32, i32
  }
  func.func @transform_1(%arg0: i32) -> (i32, i32) {
    %c0_i32 = arith.constant 0 : i32
    %c0_i32_0 = arith.constant 0 : i32
    %c0_i32_1 = arith.constant 0 : i32
    return %c0_i32, %c0_i32_0 : i32, i32
  }
  func.func @transform_2(%arg0: i32) -> (i32, i32) {
    %c0_i32 = arith.constant 0 : i32
    %c0_i32_0 = arith.constant 0 : i32
    %c0_i32_1 = arith.constant 0 : i32
    return %c0_i32, %c0_i32_0 : i32, i32
  }
  func.func @transform_3(%arg0: i32) -> (i32, i32) {
    %c0_i32 = arith.constant 0 : i32
    %c0_i32_0 = arith.constant 0 : i32
    %c0_i32_1 = arith.constant 0 : i32
    return %c0_i32, %c0_i32_0 : i32, i32
  }
  func.func @transform_4(%arg0: i32) -> (i32, i32) {
    %c0_i32 = arith.constant 0 : i32
    %c0_i32_0 = arith.constant 0 : i32
    %c0_i32_1 = arith.constant 0 : i32
    return %c0_i32, %c0_i32_0 : i32, i32
  }
  func.func @transform_5(%arg0: i32) -> (i32, i32) {
    %c0_i32 = arith.constant 0 : i32
    %c0_i32_0 = arith.constant 0 : i32
    %c0_i32_1 = arith.constant 0 : i32
    return %c0_i32, %c0_i32_0 : i32, i32
  }
  func.func @transform_6(%arg0: i32) -> (i32, i32) {
    %c0_i32 = arith.constant 0 : i32
    %c0_i32_0 = arith.constant 0 : i32
    %c0_i32_1 = arith.constant 0 : i32
    return %c0_i32, %c0_i32_0 : i32, i32
  }
  func.func @transform_7(%arg0: i32) -> (i32, i32) {
    %c0_i32 = arith.constant 0 : i32
    %c0_i32_0 = arith.constant 0 : i32
    return %arg0, %c0_i32 : i32, i32
  }
}

</mosaic_0001>

<bundles_post_ra>
// kernel: projection_head.1
= control target key start
LH: loop header
LB: loop body
LE: loop exit
PB: predicated region body
PF: predicated region fallthrough
CT: control target
= control target key end

     0   :  { %12 = vsyncpa [#allocation3], 0  ;;  %s1453_s0 = inlined_call_operand.vmem [shape: f32[72,64], index: 0, kind: input, shape index: {}]   ;;  %s1454_s1 = inlined_call_operand.hbm [shape: f32[64,128], index: 1, kind: input, shape index: {}]   ;;  %s1455_s2 = inlined_call_operand.vmem [shape: f32[1,128], index: 2, kind: input, shape index: {}]   ;;  %s1456_s3 = inlined_call_operand.vmem [shape: f32[128,128], index: 3, kind: input, shape index: {}]   ;;  %s1457_s4 = inlined_call_operand.vmem [shape: f32[1,128], index: 4, kind: input, shape index: {}]   ;;  %s1458_s5 = inlined_call_operand.vmem [shape: f32[1,128], index: 5, kind: input, shape index: {}]   ;;  %s1459_s6 = inlined_call_operand.vmem [shape: f32[1,128], index: 6, kind: input, shape index: {}]   ;;  %s1460_s7 = inlined_call_operand.hbm [shape: f32[72,128], index: 7, kind: output, shape index: {}]  }
   0x1   :  { %13 = vsyncpa [#allocation4], 0 }
   0x2   :  { %15 = vsyncpa [#allocation4 + $0x1], 0  ;;  %s1115_s24 = smov 0   ;;  %s1117_s25 = smov 0  }
   0x3   :  { %s1119_s26 = smov 0   ;;  %s1121_s27 = smov 0  }
   0x4 LB: > { %s1136_s28 = sadd.s32 4294967295, %s1066_s27   ;;  %s824_s29 = sadd.s32 4294967294, %s1066_s27   ;;  %s1066_s27 = sphi %s1121_s27, %s1469_s27   ;;  %s1062_s26 = sphi %s1119_s26, %s1468_s26   ;;  %s1058_s25 = sphi %s1117_s25, %s1467_s25   ;;  %s1054_s24 = sphi %s1115_s24, %s1466_s24  }
   0x5   : > { %s1140_s30 = sadd.s32 1, %s1066_s27   ;;  %s180_s8 = sadd.s32 1, %s1062_s26 }
   0x6   : > { %s177_s9 = ssub.s32 %s1066_s27, %s1140_s30  ;;  %p190_p0 = scmp.ne.s32.totalorder %s1062_s26, %s1058_s25 }
   0x7   : > { %p178_p1 = scmp.eq.s32.totalorder %s177_s9, 0  ;;  %p191_p2 = scmp.eq.s32.totalorder %s1136_s28, 2 }
   0x8   : > { %p196_p3 = scmp.ne.s32.totalorder %s1058_s25, %s1054_s24  ;;  %p197_p4 = scmp.eq.s32.totalorder %s824_s29, 2 }
   0x9   : > { %s1151_s10 = scalar_select %p178_p1, %s1062_s26, %s180_s8  }
   0xa   : > { %p1153_p5 = por %p191_p2, %p190_p0  ;;  %p1157_p6 = por %p197_p4, %p196_p3 }
   0xb   : > { %p825_p7 = scmp.ge.s32.totalorder %s1066_s27, 1  ;;  %p204_p8 = scmp.lt.s32.totalorder %s1066_s27, 4 }
   0xc   : > { %p896_p9 = scmp.eq.s32.totalorder %s1136_s28, 0  ;;  %s215_s15 = sshll.u32 %s1454_s1, 4  ;;  %s216_s15 = int_to_ptr.hbm [resolvable:$true] %s215_s15 }
   0xd   : > { %p205_p10 = pnand %p825_p7, %p204_p8  ;;  %s1068_s16 = smov [#allocation2]  }
   0xe   : > { %s217_s17 = sshll.u32 %s1068_s16, 4  ;;  %s1069_s18 = smov 128   ;;  %s218_s17 = int_to_ptr.vmem [resolvable:$true] %s217_s17 }
   0xf   : > { %p888_p11 = pneg %p205_p10  ;;  %s1070_s19 = smov 8  }
  0x10   : > { %265 = sbr.rel (%p205_p10) target bundleno = 567 (0x237), region = 48 }
  0x11   : > { %p889_p12 = pnand %p896_p9, %p888_p11 }
  0x13   : > { %891 = dma.hbm_to_vmem [thread:$0]  (!%p889_p12), %s216_s15, 1024, %s218_s17, [#allocation3], %s1069_s18, %s1069_s18, %s1070_s19  }
  0x15   : > { %1045 = dma.done.wait (%p896_p9), [#allocation3], 1024  }
  0x16   : > { %1047 = vsyncadd (%p896_p9), [#allocation3], 4294966272  ;;  %s1174_s20 = sshll.u32 %s1136_s28, 2  ;;  %v332_v0 = vld [vmem:[#allocation2 + $0x38] sm:$0xff]  ;;  %v331_v1 = vld [vmem:[#allocation2 + $0x30] sm:$0xff]  ;;  %vm337_vm0 = vcmask 523264  }
  0x17   : > { %p307_p13 = scmp.lt.s32.totalorder %s1174_s20, 8  ;;  %358 = vmatpush.msra.mxu0 %v332_v0  ;;  %v330_v2 = vld [vmem:[#allocation2 + $0x28] sm:$0xff]  ;;  %v329_v3 = vld [vmem:[#allocation2 + $0x20] sm:$0xff]  ;;  %v328_v4 = vld [vmem:[#allocation2 + $0x18] sm:$0xff]  ;;  %s736_s17 = ssub.s32 (%p1153_p5), 9, %s1174_s20 }
  0x18   : > { %v327_v5 = vld [vmem:[#allocation2 + $0x10] sm:$0xff]  ;;  %v326_v6 = vld [vmem:[#allocation2 + $0x8] sm:$0xff]  ;;  %v325_v7 = vld [vmem:[#allocation2] sm:$0xff]  ;;  %p737_p0 = scmp.lt.s32.totalorder (%p1153_p5), %s736_s17, 4 }
  0x19   : > { %359 = vmatpush.msra.mxu0 %v331_v1  ;;  %s308_s21 = scalar_select %p307_p13, %s1174_s20, 8  ;;  %v570_v12 = vld [vmem:[%s1456_s3 + $0x78] sm:$0xff]  ;;  %v569_v13 = vld [vmem:[%s1456_s3 + $0x70] sm:$0xff]  ;;  %v568_v14 = vld [vmem:[%s1456_s3 + $0x68] sm:$0xff] }
  0x1a   : > { %575 = vmatpush.msra.mxu1 %v570_v12  ;;  %851 = vmatpush.msra.mxu2 %v570_v12  ;;  %v567_v15 = vld [vmem:[%s1456_s3 + $0x60] sm:$0xff]  ;;  %v566_v17 = vld [vmem:[%s1456_s3 + $0x58] sm:$0xff]  ;;  %v565_v18 = vld [vmem:[%s1456_s3 + $0x50] sm:$0xff] }
  0x1b   : > { %360 = vmatpush.msra.mxu0 %v330_v2  ;;  %s832_s22 = sshll.u32 %s308_s21, 3  ;;  %852 = vmatpush.msra.mxu3 %v570_v12  ;;  %v1196_v16 = vld [vmem:[%s1455_s2] ss:$0 sm:$0xff]  ;;  %v564_v20 = vld [vmem:[%s1456_s3 + $0x48] sm:$0xff]  ;;  %v562_v24 = vld [vmem:[%s1456_s3 + $0x38] sm:$0xff]  ;;  %s299_s21 = sand.u32 1, %s1058_s25  }
  0x1c   : > { %s310_s8 = scalar_lea.vmem %s1453_s0, %s832_s22  ;;  %576 = vmatpush.msra.mxu1 %v569_v13  ;;  %853 = vmatpush.msra.mxu2 %v569_v13  ;;  %v563_v22 = vld [vmem:[%s1456_s3 + $0x40] sm:$0xff]  ;;  %v561_v26 = vld [vmem:[%s1456_s3 + $0x30] sm:$0xff]  ;;  %v560_v29 = vld [vmem:[%s1456_s3 + $0x28] sm:$0xff]  ;;  %s830_s9 = sshll.u32 %s299_s21, 5 }
  0x1d   : > { %361 = vmatpush.msra.mxu0 %v329_v3  ;;  %v321_v8 = vld [vmem:[%s310_s8] sm:$0xff]  ;;  %v322_v9 = vld [vmem:[%s310_s8 + $0x8] sm:$0xff]  ;;  %v323_v10 = vld [vmem:[%s310_s8 + $0x10] sm:$0xff]  ;;  %854 = vmatpush.msra.mxu3 %v569_v13  ;;  %s1373_s15 = scalar_lea.vmem [#allocation5], %s830_s9  ;;  %s1392_s16 = scalar_lea.sflag [#allocation4], %s299_s21 }
  0x1e   : > { %v324_v11 = vld [vmem:[%s310_s8 + $0x18] sm:$0xff]  ;;  %577 = vmatpush.msra.mxu1 %v568_v14  ;;  %855 = vmatpush.msra.mxu2 %v568_v14  ;;  %v559_v33 = vld [vmem:[%s1456_s3 + $0x20] sm:$0xff]  ;;  %v557_v41 = vld [vmem:[%s1456_s3 + $0x10] sm:$0xff] }
  0x1f   : > { %362 = vmatpush.msra.mxu0 %v328_v4  ;;  %856 = vmatpush.msra.mxu3 %v568_v14  ;;  %v558_v37 = vld [vmem:[%s1456_s3 + $0x18] sm:$0xff]  ;;  %v556_v46 = vld [vmem:[%s1456_s3 + $0x8] sm:$0xff]  ;;  %v555_v50 = vld [vmem:[%s1456_s3] sm:$0xff] }
  0x20   : > { %578 = vmatpush.msra.mxu1 %v567_v15  ;;  %857 = vmatpush.msra.mxu2 %v567_v15 }
  0x21   : > { %363 = vmatpush.msra.mxu0 %v327_v5  ;;  %858 = vmatpush.msra.mxu3 %v567_v15 }
  0x22   : > { %579 = vmatpush.msra.mxu1 %v566_v17  ;;  %859 = vmatpush.msra.mxu2 %v566_v17 }
  0x23   : > { %364 = vmatpush.msra.mxu0 %v326_v6  ;;  %860 = vmatpush.msra.mxu3 %v566_v17 }
  0x24   : > { %580 = vmatpush.msra.mxu1 %v565_v18  ;;  %861 = vmatpush.msra.mxu2 %v565_v18 }
  0x25   : > { %365 = vmatpush.msra.mxu0 %v325_v7  ;;  %862 = vmatpush.msra.mxu3 %v565_v18 }
  0x26   : > { %833 = vmatmul.msk.f32.vlgmr.msra.gmra.mxu0 %vm337_vm0, %v321_v8  ;;  %581 = vmatpush.msra.mxu1 %v564_v20 }
  0x27   : > { %863 = vmatpush.msra.mxu2 %v564_v20  ;;  %864 = vmatpush.msra.mxu3 %v564_v20 }
  0x28   : > { %582 = vmatpush.msra.mxu1 %v563_v22 }
  0x29   : > { %865 = vmatpush.msra.mxu2 %v563_v22  ;;  %866 = vmatpush.msra.mxu3 %v563_v22 }
  0x2a   : > { %583 = vmatpush.msra.mxu1 %v562_v24 }
  0x2b   : > { %867 = vmatpush.msra.mxu2 %v562_v24  ;;  %868 = vmatpush.msra.mxu3 %v562_v24 }
  0x2c   : > { %584 = vmatpush.msra.mxu1 %v561_v26 }
  0x2d   : > { %869 = vmatpush.msra.mxu2 %v561_v26  ;;  %870 = vmatpush.msra.mxu3 %v561_v26 }
  0x2e   : > { %834 = vmatmul.msk.f32.gmra.mxu0 %vm337_vm0, %v322_v9  ;;  %585 = vmatpush.msra.mxu1 %v560_v29 }
  0x2f   : > { %871 = vmatpush.msra.mxu2 %v560_v29  ;;  %872 = vmatpush.msra.mxu3 %v560_v29 }
  0x30   : > { %586 = vmatpush.msra.mxu1 %v559_v33 }
  0x31   : > { %873 = vmatpush.msra.mxu2 %v559_v33  ;;  %874 = vmatpush.msra.mxu3 %v559_v33 }
  0x32   : > { %587 = vmatpush.msra.mxu1 %v558_v37 }
  0x33   : > { %875 = vmatpush.msra.mxu2 %v558_v37  ;;  %876 = vmatpush.msra.mxu3 %v558_v37 }
  0x34   : > { %588 = vmatpush.msra.mxu1 %v557_v41 }
  0x35   : > { %877 = vmatpush.msra.mxu2 %v557_v41  ;;  %878 = vmatpush.msra.mxu3 %v557_v41 }
  0x36   : > { %835 = vmatmul.msk.f32.gmra.mxu0 %vm337_vm0, %v323_v10  ;;  %589 = vmatpush.msra.mxu1 %v556_v46 }
  0x37   : > { %879 = vmatpush.msra.mxu2 %v556_v46  ;;  %880 = vmatpush.msra.mxu3 %v556_v46 }
  0x38   : > { %590 = vmatpush.msra.mxu1 %v555_v50 }
  0x39   : > { %881 = vmatpush.msra.mxu2 %v555_v50  ;;  %882 = vmatpush.msra.mxu3 %v555_v50 }
  0x3e   : > { %836 = vmatmul.msk.f32.gmra.mxu0 %vm337_vm0, %v324_v11 }
  0xa3   : > { %v367_v19 = vpop.f32.mrf.mxu0 }
  0xa4   : > { %v1208_v21 = vadd.f32 %v1196_v16, %v367_v19 }
  0xa6   : > { %v1214_v23 = vmul.f32 0.70710677, %v1208_v21 }
  0xa8   : > { %v387_v25 = vmul.f32 %v1214_v23, %v1214_v23 }
  0xaa   : > { %v1224_v27 = vmin.f32 %v387_v25, 16.0 }
  0xab   : > { %v370_v28 = vpop.f32.mrf.mxu0 }
  0xac   : > { %v1230_v30 = vadd.f32 %v1196_v16, %v370_v28  ;;  %v389_v31 = vmul.f32 2.1237322e-06, %v1224_v27  ;;  %v400_v32 = vmul.f32 3.8918573e-05, %v1224_v27 }
  0xae   : > { %v1238_v34 = vmul.f32 0.70710677, %v1230_v30  ;;  %v390_v35 = vadd.f32 0.00028619796, %v389_v31  ;;  %v401_v36 = vadd.f32 0.001143296, %v400_v32 }
  0xb0   : > { %v427_v38 = vmul.f32 %v1238_v34, %v1238_v34  ;;  %v391_v39 = vmul.f32 %v390_v35, %v1224_v27  ;;  %v402_v40 = vmul.f32 %v401_v36, %v1224_v27 }
  0xb2   : > { %v1250_v42 = vmin.f32 %v427_v38, 16.0  ;;  %v392_v43 = vadd.f32 0.0036580483, %v391_v39  ;;  %v403_v44 = vadd.f32 0.014752088, %v402_v40 }
  0xb3   : > { %v373_v45 = vpop.f32.mrf.mxu0 }
  0xb4   : > { %v1256_v47 = vadd.f32 %v1196_v16, %v373_v45  ;;  %v404_v48 = vmul.f32 %v403_v44, %v1224_v27  ;;  %v429_v49 = vmul.f32 2.1237322e-06, %v1250_v42  ;;  %v393_v51 = vmul.f32 %v392_v43, %v1224_v27 }
  0xb5   : > { %v440_v52 = vmul.f32 3.8918573e-05, %v1250_v42 }
  0xb6   : > { %v1266_v53 = vmul.f32 0.70710677, %v1256_v47  ;;  %v405_v54 = vadd.f32 0.112945676, %v404_v48  ;;  %v430_v55 = vadd.f32 0.00028619796, %v429_v49 }
  0xb7   : > { %v441_v56 = vadd.f32 0.001143296, %v440_v52  ;;  %v394_v59 = vadd.f32 0.05243302, %v393_v51 }
  0xb8   : > { %v467_v57 = vmul.f32 %v1266_v53, %v1266_v53  ;;  %v406_v58 = vmul.f32 %v405_v54, %v1224_v27  ;;  %v431_v60 = vmul.f32 %v430_v55, %v1250_v42 }
  0xb9   : > { %v442_v61 = vmul.f32 %v441_v56, %v1250_v42  ;;  %v395_v6 = vmul.f32 %v394_v59, %v1224_v27 }
  0xba   : > { %v1273_v62 = vmin.f32 %v467_v57, 16.0  ;;  %v407_v63 = vadd.f32 0.4994258, %v406_v58  ;;  %v432_v1 = vadd.f32 0.0036580483, %v431_v60 }
  0xbb   : > { %v376_v0 = vpop.f32.mrf.mxu0  ;;  %v443_v2 = vadd.f32 0.014752088, %v442_v61  ;;  %v396_v15 = vadd.f32 0.18741608, %v395_v6 }
  0xbc   : > { %v1276_v3 = vadd.f32 %v1196_v16, %v376_v0  ;;  %v408_v4 = vmul.f32 %v407_v63, %v1224_v27  ;;  %v469_v5 = vmul.f32 2.1237322e-06, %v1273_v62  ;;  %v433_v10 = vmul.f32 %v432_v1, %v1250_v42 }
  0xbd   : > { %v444_v7 = vmul.f32 %v443_v2, %v1250_v42  ;;  %v480_v11 = vmul.f32 3.8918573e-05, %v1273_v62  ;;  %v397_v28 = vmul.f32 %v396_v15, %v1224_v27 }
  0xbe   : > { %v1283_v8 = vmul.f32 0.70710677, %v1276_v3  ;;  %v409_v9 = vadd.f32 1.0, %v408_v4  ;;  %v470_v13 = vadd.f32 0.00028619796, %v469_v5 }
  0xbf   : > { %v445_v12 = vadd.f32 0.112945676, %v444_v7  ;;  %v434_v18 = vadd.f32 0.05243302, %v433_v10  ;;  %v481_v19 = vadd.f32 0.001143296, %v480_v11 }
  0xc0   : > { %v507_v14 = vmul.f32 %v1283_v8, %v1283_v8  ;;  %941 = vrcp.f32 %v409_v9  ;;  %v471_v22 = vmul.f32 %v470_v13, %v1273_v62  ;;  %v398_v44 = vadd.f32 1.1283791, %v397_v28 }
  0xc1   : > { %v446_v16 = vmul.f32 %v445_v12, %v1250_v42  ;;  %v482_v24 = vmul.f32 %v481_v19, %v1273_v62  ;;  %v435_v32 = vmul.f32 %v434_v18, %v1250_v42  ;;  %v419_v27 = vand.u32 2147483647, %v409_v9 }
  0xc2   : > { %v1290_v17 = vmin.f32 %v507_v14, 16.0  ;;  %v472_v39 = vadd.f32 0.0036580483, %v471_v22  ;;  %v421_v46 = vand.u32 2147483648, %v409_v9  ;;  %vm415_vm2 = vweird.f32 %v409_v9 }
  0xc3   : > { %v447_v20 = vadd.f32 0.4994258, %v446_v16  ;;  %v483_v33 = vadd.f32 0.014752088, %v482_v24  ;;  %v436_v48 = vadd.f32 0.18741608, %v435_v32  ;;  %v399_v58 = vmul.f32 %v398_v44, %v1214_v23 }
  0xc4   : > { %v509_v25 = vmul.f32 2.1237322e-06, %v1290_v17  ;;  %v520_v26 = vmul.f32 3.8918573e-05, %v1290_v17  ;;  %v473_v51 = vmul.f32 %v472_v39, %v1273_v62  ;;  %v422_v59 = vor.u32 1.1754944e-38, %v421_v46 }
  0xc5   : > { %v448_v29 = vmul.f32 %v447_v20, %v1250_v42  ;;  %v484_v40 = vmul.f32 %v483_v33, %v1273_v62  ;;  %v437_v60 = vmul.f32 %v436_v48, %v1250_v42  ;;  %vm420_vm4 = vcmp.eq.f32.partialorder %v419_v27, 8.507059e+37 }
  0xc6   : > { %v942_v31 = vpop.eup %941  ;;  %v510_v35 = vadd.f32 0.00028619796, %v509_v25  ;;  %v521_v36 = vadd.f32 0.001143296, %v520_v26  ;;  %v474_v1 = vadd.f32 0.05243302, %v473_v51 }
  0xc7   : > { %v411_v37 = vmul.f32 %v942_v31, %v409_v9  ;;  %v449_v38 = vadd.f32 1.0, %v448_v29  ;;  %v485_v49 = vadd.f32 0.112945676, %v484_v40  ;;  %vm416_vm1 = vweird.f32 %v942_v31 }
  0xc8   : > { %v511_v41 = vmul.f32 %v510_v35, %v1290_v17  ;;  %v522_v43 = vmul.f32 %v521_v36, %v1290_v17  ;;  %vm417_vm3 = vmor %vm415_vm2, %vm416_vm1  ;;  %v438_v23 = vadd.f32 1.1283791, %v437_v60  ;;  %v475_v42 = vmul.f32 %v474_v1, %v1273_v62 }
  0xc9   : > { %v412_v45 = vsub.f32 1.0, %v411_v37  ;;  %943 = vrcp.f32 %v449_v38  ;;  %v486_v54 = vmul.f32 %v485_v49, %v1273_v62  ;;  %v461_v12 = vand.u32 2147483648, %v449_v38 }
  0xca   : > { %v523_v52 = vadd.f32 0.014752088, %v522_v43  ;;  %v512_v55 = vadd.f32 0.0036580483, %v511_v41  ;;  %v459_v18 = vand.u32 2147483647, %v449_v38  ;;  %vm455_vm6 = vweird.f32 %v449_v38 }
  0xcb   : > { %v413_v50 = vmul.f32 %v942_v31, %v412_v45  ;;  %v487_v61 = vadd.f32 0.4994258, %v486_v54  ;;  %v379_v20 = vmul.f32 0.5, %v1208_v21  ;;  %v439_v28 = vmul.f32 %v438_v23, %v1238_v34 }
  0xcc   : > { %v524_v57 = vmul.f32 %v523_v52, %v1290_v17  ;;  %v513_v6 = vmul.f32 %v512_v55, %v1290_v17  ;;  %v462_v29 = vor.u32 1.1754944e-38, %v461_v12  ;;  %vm460_vm8 = vcmp.eq.f32.partialorder %v459_v18, 8.507059e+37 }
  0xcd   : > { %v414_v56 = vadd.f32 %v942_v31, %v413_v50  ;;  %v488_v9 = vmul.f32 %v487_v61, %v1273_v62  ;;  %v380_v34 = vmul.f32 0.5, %v1230_v30 }
  0xce   : > { %v525_v2 = vadd.f32 0.112945676, %v524_v57  ;;  %v514_v19 = vadd.f32 0.05243302, %v513_v6  ;;  %v381_v6 = vmul.f32 0.5, %v1256_v47 }
  0xcf   : > { %v944_v63 = vpop.eup %943  ;;  %v418_v0 = vsel %vm417_vm3, %v942_v31, %v414_v56  ;;  %v489_v14 = vadd.f32 1.0, %v488_v9  ;;  %v476_v31 = vadd.f32 0.18741608, %v475_v42 }
  0xd0   : > { %v423_v4 = vsel %vm420_vm4, %v422_v59, %v418_v0  ;;  %v451_v5 = vmul.f32 %v944_v63, %v449_v38  ;;  %v526_v10 = vmul.f32 %v525_v2, %v1290_v17  ;;  %vm456_vm5 = vweird.f32 %v944_v63 }
  0xd1   : > { %v424_v7 = vmul.f32 %v423_v4, %v399_v58  ;;  %945 = vrcp.f32 %v489_v14  ;;  %vm457_vm7 = vmor %vm455_vm6, %vm456_vm5  ;;  %v515_v33 = vmul.f32 %v514_v19, %v1290_v17  ;;  %v477_v38 = vmul.f32 %v476_v31, %v1273_v62 }
  0xd2   : > { %v452_v11 = vsub.f32 1.0, %v451_v5  ;;  %v527_v15 = vadd.f32 0.4994258, %v526_v10  ;;  %v499_v46 = vand.u32 2147483647, %v489_v14  ;;  %v501_v48 = vand.u32 2147483648, %v489_v14 }
  0xd3   : > { %v837_v13 = vclamps-f32 %v424_v7, 1.0  ;;  %v516_v43 = vadd.f32 0.18741608, %v515_v33  ;;  %v478_v27 = vadd.f32 1.1283791, %v477_v38  ;;  %vm495_vm10 = vweird.f32 %v489_v14 }
  0xd4   : > { %v453_v16 = vmul.f32 %v944_v63, %v452_v11  ;;  %v528_v25 = vmul.f32 %v527_v15, %v1290_v17  ;;  %v502_v56 = vor.u32 1.1754944e-38, %v501_v48  ;;  %vm500_vm12 = vcmp.eq.f32.partialorder %v499_v46, 8.507059e+37 }
  0xd5   : > { %v547_v22 = vadd.f32 1.0, %v837_v13  ;;  %v517_v52 = vmul.f32 %v516_v43, %v1290_v17  ;;  %v479_v62 = vmul.f32 %v478_v27, %v1266_v53  ;;  %v382_v13 = vmul.f32 0.5, %v1276_v3 }
  0xd6   : > { %v454_v24 = vadd.f32 %v944_v63, %v453_v16  ;;  %v529_v35 = vadd.f32 1.0, %v528_v25  ;;  %v1071_v33 = vmov 128.0  }
  0xd7   : > { %v551_v26 = vmul.f32 %v547_v22, %v379_v20  ;;  %v946_v39 = vpop.eup %945  ;;  %v518_v59 = vadd.f32 1.1283791, %v517_v52 }
  0xd8   : > { %v458_v32 = vsel %vm457_vm7, %v944_v63, %v454_v24  ;;  %947 = vrcp.f32 %v529_v35  ;;  %v491_v41 = vmul.f32 %v946_v39, %v489_v14  ;;  %vm496_vm9 = vweird.f32 %v946_v39 }
  0xd9   : > { %591 = vmatmul.f32.vlgmr.msra.gmra.mxu1 %v551_v26  ;;  %v463_v36 = vsel %vm460_vm8, %v462_v29, %v458_v32  ;;  %vm497_vm11 = vmor %vm495_vm10, %vm496_vm9  ;;  %v541_v60 = vand.u32 2147483648, %v529_v35  ;;  %v539_v0 = vand.u32 2147483647, %v529_v35  ;;  %vm535_vm14 = vweird.f32 %v529_v35 }
  0xda   : > { %v464_v37 = vmul.f32 %v463_v36, %v439_v28  ;;  %v492_v45 = vsub.f32 1.0, %v491_v41  ;;  %v519_v53 = vmul.f32 %v518_v59, %v1283_v8  ;;  %v938_v8 = vld [vmem:[%s1457_s4] ss:$0 sm:$0xff]  ;;  %949 = vrcp.f32 %v1071_v33 }
  0xdb   : > { %v542_v4 = vor.u32 1.1754944e-38, %v541_v60  ;;  %vm540_vm0 = vcmp.eq.f32.partialorder %v539_v0, 8.507059e+37 }
  0xdc   : > { %v838_v40 = vclamps-f32 %v464_v37, 1.0  ;;  %v493_v51 = vmul.f32 %v946_v39, %v492_v45 }
  0xde   : > { %v548_v44 = vadd.f32 1.0, %v838_v40  ;;  %v948_v49 = vpop.eup %947  ;;  %v494_v55 = vadd.f32 %v946_v39, %v493_v51 }
  0xdf   : > { %v531_v54 = vmul.f32 %v948_v49, %v529_v35  ;;  %vm536_vm13 = vweird.f32 %v948_v49 }
  0xe0   : > { %v552_v50 = vmul.f32 %v548_v44, %v380_v34  ;;  %v498_v58 = vsel %vm497_vm11, %v946_v39, %v494_v55  ;;  %vm537_vm15 = vmor %vm535_vm14, %vm536_vm13 }
  0xe1   : > { %v532_v57 = vsub.f32 1.0, %v531_v54  ;;  %v503_v61 = vsel %vm500_vm12, %v502_v56, %v498_v58 }
  0xe2   : > { %594 = vmatmul.f32.vlgmr.msra.gmra.mxu2 %v552_v50  ;;  %v504_v1 = vmul.f32 %v503_v61, %v479_v62 }
  0xe3   : > { %v533_v63 = vmul.f32 %v948_v49, %v532_v57 }
  0xe4   : > { %v839_v17 = vclamps-f32 %v504_v1, 1.0 }
  0xe5   : > { %v534_v2 = vadd.f32 %v948_v49, %v533_v63  ;;  %v1360_v63 = vld [vmem:[%s1458_s5] ss:$0 sm:$0xff] }
  0xe6   : > { %v549_v7 = vadd.f32 1.0, %v839_v17  ;;  %v1368_v17 = vld [vmem:[%s1459_s6] ss:$0 sm:$0xff] }
  0xe7   : > { %v538_v5 = vsel %vm537_vm15, %v948_v49, %v534_v2 }
  0xe8   : > { %v543_v9 = vsel %vm540_vm0, %v542_v4, %v538_v5  ;;  %v553_v23 = vmul.f32 %v549_v7, %v381_v6 }
  0xe9   : > { %v544_v10 = vmul.f32 %v543_v9, %v519_v53 }
  0xea   : > { %597 = vmatmul.f32.vlgmr.msra.gmra.mxu3 %v553_v23 }
  0xeb   : > { %v840_v11 = vclamps-f32 %v544_v10, 1.0 }
  0xed   : > { %v550_v12 = vadd.f32 1.0, %v840_v11 }
  0xef   : > { %v554_v42 = vmul.f32 %v550_v12, %v382_v13 }
  0xf2   : > { %600 = vmatmul.f32.gmra.mxu3 %v554_v42 }
 0x156   : > { %v592_v14 = vpop.f32.mrf.mxu1 }
 0x157   : > { %v593_v15 = vadd.f32 %v938_v8, %v592_v14 }
 0x159   : > { %v1327_v16 = vadd.f32 %v593_v15, %v1208_v21 }
 0x15b   : > { %608 = vadd.xlane.f32.xlu0 %v1327_v16  ;;  %v627_v18 = vmul.f32 %v1327_v16, %v1327_v16 }
 0x15d   : > { %631 = vadd.xlane.f32.xlu2 %v627_v18 }
 0x165   : > { %v595_v19 = vpop.f32.mrf.mxu2 }
 0x166   : > { %v596_v20 = vadd.f32 %v938_v8, %v595_v19 }
 0x168   : > { %v1333_v22 = vadd.f32 %v596_v20, %v1230_v30 }
 0x16a   : > { %610 = vadd.xlane.f32.xlu0 %v1333_v22  ;;  %v628_v24 = vmul.f32 %v1333_v22, %v1333_v22 }
 0x16c   : > { %633 = vadd.xlane.f32.xlu2 %v628_v24 }
 0x16d   : > { %v598_v25 = vpop.f32.mrf.mxu3 }
 0x16e   : > { %v599_v21 = vadd.f32 %v938_v8, %v598_v25 }
 0x170   : > { %v1339_v26 = vadd.f32 %v599_v21, %v1256_v47  ;;  %v950_v47 = vpop.eup %949 }
 0x171   : > { %v617_v35 = vmul.f32 128.0, %v950_v47  ;;  %vm621_vm1 = vweird.f32 %v950_v47 }
 0x172   : > { %612 = vadd.xlane.f32.xlu1 %v1339_v26  ;;  %v629_v28 = vmul.f32 %v1339_v26, %v1339_v26 }
 0x173   : > { %v618_v36 = vsub.f32 1.0, %v617_v35 }
 0x174   : > { %635 = vadd.xlane.f32.xlu0 %v629_v28 }
 0x175   : > { %v601_v29 = vpop.f32.mrf.mxu3  ;;  %v619_v37 = vmul.f32 %v950_v47, %v618_v36 }
 0x176   : > { %v602_v30 = vadd.f32 %v938_v8, %v601_v29 }
 0x177   : > { %v620_v39 = vadd.f32 %v950_v47, %v619_v37 }
 0x178   : > { %v1345_v31 = vadd.f32 %v602_v30, %v1276_v3 }
 0x179   : > { %v1350_v38 = vsel %vm621_vm1, %v950_v47, %v620_v39 }
 0x17a   : > { %614 = vadd.xlane.f32.xlu1 %v1345_v31  ;;  %v630_v32 = vmul.f32 %v1345_v31, %v1345_v31 }
 0x182   : > { %637 = vadd.xlane.f32.xlu1 %v630_v32 }
 0x1ce   : > { %v609_v40 = vpop.xlane.xlu0 %608 }
 0x1cf   : > { %v623_v3 = vmul.f32 %v1350_v38, %v609_v40 }
 0x1d0   : > { %v632_v41 = vpop.xlane.xlu2 %631 }
 0x1d1   : > { %v643_v43 = vmul.f32 %v623_v3, %v623_v3  ;;  %v639_v34 = vmul.f32 %v632_v41, %v1350_v38  ;;  %v655_v61 = vsub.f32 %v1327_v16, %v623_v3 }
 0x1d3   : > { %v647_v44 = vsub.f32 %v639_v34, %v643_v43 }
 0x1d5   : > { %v651_v45 = vmax.f32 %v647_v44, 0.0 }
 0x1d7   : > { %v659_v27 = vadd.f32 1e-05, %v651_v45 }
 0x1d9   : > { %951 = vrsqrt.f32 %v659_v27  ;;  %vm669_vm3 = vweird.f32 %v659_v27 }
 0x1dd   : > { %v611_v46 = vpop.xlane.xlu0 %610 }
 0x1de   : > { %v624_v48 = vmul.f32 %v1350_v38, %v611_v46 }
 0x1df   : > { %v952_v49 = vpop.eup %951  ;;  %v634_v50 = vpop.xlane.xlu2 %633 }
 0x1e0   : > { %v664_v51 = vmul.f32 %v952_v49, %v659_v27  ;;  %v644_v52 = vmul.f32 %v624_v48, %v624_v48  ;;  %v640_v54 = vmul.f32 %v634_v50, %v1350_v38  ;;  %vm670_vm2 = vweird.f32 %v952_v49 }
 0x1e1   : > { %vm671_vm4 = vmor %vm669_vm3, %vm670_vm2  ;;  %v656_v19 = vsub.f32 %v1333_v22, %v624_v48 }
 0x1e2   : > { %v665_v55 = vmul.f32 %v952_v49, %v664_v51  ;;  %v648_v62 = vsub.f32 %v640_v54, %v644_v52 }
 0x1e4   : > { %v666_v56 = vmul.f32 0.5, %v665_v55  ;;  %v652_v57 = vmax.f32 %v648_v62, 0.0 }
 0x1e5   : > { %v613_v0 = vpop.xlane.xlu1 %612 }
 0x1e6   : > { %v667_v58 = vsub.f32 1.5, %v666_v56  ;;  %v660_v59 = vadd.f32 1e-05, %v652_v57  ;;  %v625_v2 = vmul.f32 %v1350_v38, %v613_v0 }
 0x1e7   : > { %v636_v53 = vpop.xlane.xlu0 %635 }
 0x1e8   : > { %v668_v60 = vmul.f32 %v952_v49, %v667_v58  ;;  %953 = vrsqrt.f32 %v660_v59  ;;  %v645_v5 = vmul.f32 %v625_v2, %v625_v2  ;;  %v641_v6 = vmul.f32 %v636_v53, %v1350_v38 }
 0x1e9   : > { %vm679_vm6 = vweird.f32 %v660_v59 }
 0x1ea   : > { %v672_v1 = vsel %vm671_vm4, %v952_v49, %v668_v60  ;;  %v649_v9 = vsub.f32 %v641_v6, %v645_v5 }
 0x1eb   : > { %v703_v4 = vmul.f32 %v672_v1, %v655_v61 }
 0x1ec   : > { %v653_v12 = vmax.f32 %v649_v9, 0.0 }
 0x1ed   : > { %v711_v7 = vmul.f32 %v1360_v63, %v703_v4  ;;  %v615_v13 = vpop.xlane.xlu1 %614 }
 0x1ee   : > { %v954_v10 = vpop.eup %953  ;;  %v661_v8 = vadd.f32 1e-05, %v653_v12  ;;  %v626_v16 = vmul.f32 %v1350_v38, %v615_v13 }
 0x1ef   : > { %v719_v23 = vadd.f32 %v1368_v17, %v711_v7  ;;  %v674_v11 = vmul.f32 %v954_v10, %v660_v59  ;;  %vm680_vm5 = vweird.f32 %v954_v10 }
 0x1f0   : > { %955 = vrsqrt.f32 %v661_v8  ;;  %vm681_vm7 = vmor %vm679_vm6, %vm680_vm5  ;;  %v646_v21 = vmul.f32 %v626_v16, %v626_v16  ;;  %vm689_vm9 = vweird.f32 %v661_v8 }
 0x1f1   : > { %723 = vst [vmem:[%s1373_s15] sm:$0xff] %v719_v23  ;;  %v675_v42 = vmul.f32 %v954_v10, %v674_v11 }
 0x1f3   : > { %v676_v14 = vmul.f32 0.5, %v675_v42 }
 0x1f5   : > { %v677_v15 = vsub.f32 1.5, %v676_v14  ;;  %v638_v20 = vpop.xlane.xlu1 %637 }
 0x1f6   : > { %v956_v24 = vpop.eup %955  ;;  %v642_v28 = vmul.f32 %v638_v20, %v1350_v38  ;;  %v657_v38 = vsub.f32 %v1339_v26, %v625_v2  ;;  %v658_v26 = vsub.f32 %v1345_v31, %v626_v16 }
 0x1f7   : > { %v678_v18 = vmul.f32 %v954_v10, %v677_v15  ;;  %v684_v30 = vmul.f32 %v956_v24, %v661_v8  ;;  %vm690_vm8 = vweird.f32 %v956_v24 }
 0x1f8   : > { %v650_v32 = vsub.f32 %v642_v28, %v646_v21  ;;  %vm691_vm10 = vmor %vm689_vm9, %vm690_vm8 }
 0x1f9   : > { %v682_v25 = vsel %vm681_vm7, %v954_v10, %v678_v18  ;;  %v685_v47 = vmul.f32 %v956_v24, %v684_v30 }
 0x1fa   : > { %v704_v29 = vmul.f32 %v682_v25, %v656_v19  ;;  %v654_v35 = vmax.f32 %v650_v32, 0.0 }
 0x1fb   : > { %v686_v37 = vmul.f32 0.5, %v685_v47 }
 0x1fc   : > { %v712_v33 = vmul.f32 %v1360_v63, %v704_v29  ;;  %v662_v39 = vadd.f32 1e-05, %v654_v35 }
 0x1fd   : > { %v687_v22 = vsub.f32 1.5, %v686_v37 }
 0x1fe   : > { %v720_v36 = vadd.f32 %v1368_v17, %v712_v33  ;;  %957 = vrsqrt.f32 %v662_v39  ;;  %vm699_vm12 = vweird.f32 %v662_v39 }
 0x1ff   : > { %v688_v40 = vmul.f32 %v956_v24, %v687_v22 }
 0x200   : > { %724 = vst [vmem:[%s1373_s15 + $0x8] sm:$0xff] %v720_v36 }
 0x201   : > { %v692_v3 = vsel %vm691_vm10, %v956_v24, %v688_v40 }
 0x202   : > { %v705_v41 = vmul.f32 %v692_v3, %v657_v38 }
 0x204   : > { %v958_v43 = vpop.eup %957  ;;  %v713_v34 = vmul.f32 %v1360_v63, %v705_v41 }
 0x205   : > { %v694_v44 = vmul.f32 %v958_v43, %v662_v39  ;;  %vm700_vm11 = vweird.f32 %v958_v43 }
 0x206   : > { %v721_v45 = vadd.f32 %v1368_v17, %v713_v34  ;;  %vm701_vm13 = vmor %vm699_vm12, %vm700_vm11 }
 0x207   : > { %v695_v27 = vmul.f32 %v958_v43, %v694_v44 }
 0x208   : > { %725 = vst [vmem:[%s1373_s15 + $0x10] sm:$0xff] %v721_v45 }
 0x209   : > { %v696_v46 = vmul.f32 0.5, %v695_v27 }
 0x20b   : > { %v697_v48 = vsub.f32 1.5, %v696_v46 }
 0x20d   : > { %v698_v49 = vmul.f32 %v958_v43, %v697_v48 }
 0x20f   : > { %v702_v50 = vsel %vm701_vm13, %v958_v43, %v698_v49 }
 0x210   : > { %v706_v51 = vmul.f32 %v702_v50, %v658_v26 }
 0x212   : > { %v714_v52 = vmul.f32 %v1360_v63, %v706_v51  ;;  %734 = sbr.rel (!%p1153_p5) target bundleno = 567 (0x237), region = 56 }
 0x214   : > { %v722_v54 = vadd.f32 %v1368_v17, %v714_v52 }
 0x216   : > { %726 = vst [vmem:[%s1373_s15 + $0x18] sm:$0xff] %v722_v54 }
 0x217   : > { %s1471_s17 = smov (!%p737_p0, %s736_s17), 4 }
 0x218   : > { %s843_s18 = sshll.u32 %s1471_s17, 3 }
 0x219   : > { %s740_s19 = ssub.s32 32, %s843_s18 }
 0x21a   : > { %s741_s22 = sshll.u32 %s740_s19, 4 }
 0x21b   : > { %742 = vsyncadd %s1392_s16, %s741_s22  ;;  %p1401_p1 = scmp.ne.s32.totalorder %s843_s18, 0  ;;  %s850_s11 = sshll.u32 %s1136_s28, 5 }
 0x21c   : > { %s745_s29 = scalar_lea.hbm %s1460_s7, %s850_s11  ;;  %s747_s8 = sshll.u32 %s1373_s15, 4  ;;  %s1410_s8 = int_to_ptr.vmem [resolvable:$true] %s747_s8 }
 0x21d   : > { %s749_s9 = sshll.u32 %s745_s29, 4  ;;  %s1461_s13 = sshll.u32 %s1471_s17, 7  ;;  %s1412_s9 = int_to_ptr.hbm [resolvable:$true] %s749_s9 }
 0x21e   : > { %s989_s14 = sshra.s32 %s1410_s8, 4  ;;  %s991_s18 = sshrl.u32 %s1461_s13, 4  ;;  %s990_s14 = int_to_ptr.vmem [resolvable:$true] %s989_s14 }
 0x21f   : > { %s996_s19 = scalar_lea.vmem %s990_s14, %s991_s18  ;;  %s1072_s28 = smov [#allocation5]  }
 0x220   : > { %p997_p2 = scmp.ne.s32.totalorder %s990_s14, %s996_s19  ;;  %s1000_s22 = scalar_lea.vmem %s1072_s28, 64 }
 0x221   : > { %p1002_p5 = scmp.lt.s32.totalorder %s1000_s22, %s996_s19 }
 0x222   : > { %p998_p3 = pnand %p997_p2, %p1401_p1 }
 0x224   : > { %p999_p4 = pneg %p998_p3 }
 0x226   : > { %p1004_p7 = pnand %p1002_p5, %p999_p4 }
 0x228   : > { %1007 = shalt.err (!%p1004_p7)
}
 0x229   : > { %s1008_s15 = sshra.s32 %s1412_s9, 4  ;;  %s1019_s29 = scalar_lea.hbm %s1460_s7, 72  ;;  %s1009_s15 = int_to_ptr.hbm [resolvable:$true] %s1008_s15 }
 0x22a   : > { %s1015_s11 = scalar_lea.hbm %s1009_s15, %s991_s18  ;;  %p1020_p11 = scmp.lt.s32.totalorder %s1009_s15, %s1460_s7 }
 0x22b   : > { %p1016_p8 = scmp.ne.s32.totalorder %s1009_s15, %s1015_s11  ;;  %p1021_p12 = scmp.lt.s32.totalorder %s1019_s29, %s1015_s11 }
 0x22d   : > { %p1017_p9 = pnand %p1016_p8, %p1401_p1  ;;  %p1022_p13 = por %p1021_p12, %p1020_p11 }
 0x22f   : > { %p1018_p10 = pneg %p1017_p9 }
 0x231   : > { %p1023_p0 = pnand %p1022_p13, %p1018_p10 }
 0x233   : > { %1026 = shalt.err (!%p1023_p0)
}
 0x234   : > { %s1073_s19 = smov 128   ;;  %s1074_s18 = smov 8  }
 0x235   : > { %s1465_s28 = sshll.u32 %s1471_s17, 7 }
 0x236   : > { %755 = dma.vmem_to_hbm [thread:$0]  (%p1401_p1), %s1410_s8, %s1465_s28, %s1412_s9, %s1392_s16, %s1073_s19, %s1073_s19, %s1074_s18  }
 0x237 PF: > { %p898_p2 = scmp.ge.s32.totalorder %s1066_s27, 2  ;;  %s764_s13 = sand.u32 1, %s1054_s24  }
 0x238   : > { %s765_s22 = scalar_lea.sflag [#allocation4], %s764_s13 }
 0x239   : > { %p893_p3 = pnand %p898_p2, %p1157_p6 }
 0x23b   : > { %p894_p4 = pneg %p893_p3 }
 0x23d   : > { %1049 = dma.done.wait (%p894_p4), %s765_s22, 512  }
 0x23e   : > { %1051 = vsyncadd (%p894_p4), %s765_s22, 4294966784  ;;  %p18_p5 = scmp.ge.s32.totalorder %s1140_s30, 5   ;;  %s1466_s24 = smov %s1058_s25 }
 0x23f   : > { %s1467_s25 = smov %s1062_s26  ;;  %s1468_s26 = smov %s1151_s10 }
 0x240   : > { %s1469_s27 = smov %s1140_s30  ;;  %20 = sbr.rel (!%p18_p5) target bundleno = 4 (0x4), region = 88 }
 0x245   :  { %771 = vsyncpa [#allocation3], 1 }
 0x246   :  { %773 = vsyncpa [#allocation3 + $0x1], 1 }
 0x247   :  { %774 = vsyncpa [#allocation4], 1 }
 0x248   :  { %776 = vsyncpa [#allocation4 + $0x1], 1 }

</bundles_post_ra>
